<compile_context>
chip_gen: v6e
topology: v6e:2x2x1
jax: 0.10.0
libtpu: 0.0.40
codegen_flags: <defaults>
</compile_context>

<pallas_src>
import functools

import jax
import jax.numpy as jnp
from jax.experimental import pallas as pl
from jax.experimental.pallas import tpu as pltpu

LANE = 128


def mlp_kernel(x_ref, w1_ref, b1_ref, w2_ref, b2_ref, w3_ref, b3_ref, o_ref):
    # Single grid step: all operands are fully resident in VMEM.
    x = x_ref[...]
    h1 = jnp.dot(x, w1_ref[...], preferred_element_type=jnp.float32) + b1_ref[...]
    h1 = jnp.maximum(h1, 0.0)  # relu
    h2 = jnp.dot(h1, w2_ref[...], preferred_element_type=jnp.float32) + b2_ref[...]
    h2 = jnp.maximum(h2, 0.0)  # relu
    out = jnp.dot(h2, w3_ref[...], preferred_element_type=jnp.float32) + b3_ref[...]
    o_ref[...] = out.astype(o_ref.dtype)


def prepare_params(params, *, lane=LANE):
    """One-time parameter prep, hoisted out of the per-call forward path.

    - Biases reshaped to (1, F) so they broadcast over the batch in the kernel.
    - Last layer's columns zero-padded to a multiple of 128 lanes so the final
      store is a lane-dense, unmasked vst. Padded outputs are exactly 0*x + 0 = 0
      (no ReLU after layer 3), so the first `output_dim` columns are identical
      to the unpadded model.
    Returns (prepared_pytree, output_dim).
    """
    hidden_dim = params["w1"].shape[1]
    output_dim = params["w3"].shape[1]
    out_pad = ((output_dim + lane - 1) // lane) * lane

    w3 = jnp.zeros((hidden_dim, out_pad), jnp.float32).at[:, :output_dim].set(params["w3"])
    b3 = (
        jnp.zeros((1, out_pad), jnp.float32)
        .at[:, :output_dim]
        .set(params["b3"].reshape(1, output_dim))
    )
    prepared = {
        "w1": params["w1"],
        "b1": params["b1"].reshape(1, hidden_dim),
        "w2": params["w2"],
        "b2": params["b2"].reshape(1, hidden_dim),
        "w3": w3,
        "b3": b3,
    }
    return prepared, output_dim


@functools.partial(jax.jit, static_argnames=("output_dim", "return_padded"))
def neural_network_forward(x, prepared, *, output_dim, return_padded=False):
    """x: (B, input_dim) float32. prepared: output of prepare_params.

    Runs the whole MLP in a single Pallas invocation (no grid) with all operands
    staged in VMEM. The entire pad->kernel->slice path lives inside one jit.
    """
    B, input_dim = x.shape
    hidden_dim = prepared["w1"].shape[1]
    out_pad = prepared["w3"].shape[1]

    # Advisory cost estimate so XLA can schedule/overlap this tiny custom call.
    flops = 2 * B * (input_dim * hidden_dim + hidden_dim * hidden_dim + hidden_dim * out_pad)
    bytes_accessed = 4 * (
        B * input_dim                    # x
        + input_dim * hidden_dim + hidden_dim   # w1, b1
        + hidden_dim * hidden_dim + hidden_dim  # w2, b2
        + hidden_dim * out_pad + out_pad        # w3, b3 (padded)
        + B * out_pad                    # output
    )

    vmem_spec = pl.BlockSpec(memory_space=pltpu.MemorySpace.VMEM)

    out_padded = pl.pallas_call(
        mlp_kernel,
        out_shape=jax.ShapeDtypeStruct((B, out_pad), jnp.float32),
        in_specs=[vmem_spec] * 7,
        out_specs=vmem_spec,
        cost_estimate=pl.CostEstimate(
            flops=flops, transcendentals=0, bytes_accessed=bytes_accessed
        ),
    )(
        x,
        prepared["w1"],
        prepared["b1"],
        prepared["w2"],
        prepared["b2"],
        prepared["w3"],
        prepared["b3"],
    )

    if return_padded:
        # Consumers that can tolerate the (B, 128) padded output skip the
        # masked narrow slice entirely (it stays lane-dense end to end).
        return out_padded
    return out_padded[:, :output_dim]


def init_params(key, input_dim, hidden_dim, output_dim):
    """Deterministic init mimicking torch.nn.Linear default (U(-1/sqrt(fan_in), 1/sqrt(fan_in)))."""
    ks = jax.random.split(key, 6)

    def linear(kw, kb, fan_in, fan_out):
        bound = 1.0 / jnp.sqrt(jnp.float32(fan_in))
        w = jax.random.uniform(kw, (fan_in, fan_out), jnp.float32, -bound, bound)
        b = jax.random.uniform(kb, (fan_out,), jnp.float32, -bound, bound)
        return w, b

    w1, b1 = linear(ks[0], ks[1], input_dim, hidden_dim)
    w2, b2 = linear(ks[2], ks[3], hidden_dim, hidden_dim)
    w3, b3 = linear(ks[4], ks[5], hidden_dim, output_dim)
    return {"w1": w1, "b1": b1, "w2": w2, "b2": b2, "w3": w3, "b3": b3}


def reference_forward(x, p):
    h1 = jnp.maximum(x @ p["w1"] + p["b1"], 0.0)
    h2 = jnp.maximum(h1 @ p["w2"] + p["b2"], 0.0)
    return h2 @ p["w3"] + p["b3"]


if __name__ == "__main__":
    # Small shapes consistent with the module: batch of fused odometry features,
    # input_dim=16 (sensor/odo feature vector), hidden_dim=128 (as in the script),
    # output_dim=7 (pose: xyz + quaternion).
    batch, input_dim, hidden_dim, output_dim = 64, 16, 128, 7

    key = jax.random.PRNGKey(0)
    k_x, k_p = jax.random.split(key)
    x = jax.random.normal(k_x, (batch, input_dim), jnp.float32)
    params = init_params(k_p, input_dim, hidden_dim, output_dim)

    # One-time prep (outside the hot path), then a single jitted forward call.
    prepared, out_dim = prepare_params(params)
    out = neural_network_forward(x, prepared, output_dim=out_dim)
    out = jax.block_until_ready(out)

    ref = reference_forward(x, params)
    assert out.shape == (batch, output_dim)
    assert jnp.allclose(out, ref, atol=1e-5, rtol=1e-5)
    print("KERNEL_OK")
</pallas_src>

<mosaic_0001>
module attributes {stable_mosaic.version = 11 : i64} {
  func.func @mlp_kernel(%arg0: memref<64x16xf32, #tpu.memory_space<vmem>>, %arg1: memref<16x128xf32, #tpu.memory_space<vmem>>, %arg2: memref<1x128xf32, #tpu.memory_space<vmem>>, %arg3: memref<128x128xf32, #tpu.memory_space<vmem>>, %arg4: memref<1x128xf32, #tpu.memory_space<vmem>>, %arg5: memref<128x128xf32, #tpu.memory_space<vmem>>, %arg6: memref<1x128xf32, #tpu.memory_space<vmem>>, %arg7: memref<64x128xf32, #tpu.memory_space<vmem>>) attributes {dimension_semantics = [], scalar_prefetch = 0 : i64, scratch_operands = 0 : i64, tpu.core_type = #tpu.core_type<tc>} {
    %c0 = arith.constant 0 : index
    %c0_0 = arith.constant 0 : index
    %0 = vector.load %arg0[%c0, %c0_0] : memref<64x16xf32, #tpu.memory_space<vmem>>, vector<64x16xf32>
    %c0_1 = arith.constant 0 : index
    %c0_2 = arith.constant 0 : index
    %1 = vector.load %arg1[%c0_1, %c0_2] : memref<16x128xf32, #tpu.memory_space<vmem>>, vector<16x128xf32>
    %cst = arith.constant dense<0.000000e+00> : vector<64x128xf32>
    %2 = tpu.matmul %0, %1, %cst {dimension_numbers = #tpu.dot_dimension_numbers<[1], [0], [0], [1], [0, 0, 1, 1], [], []>} : vector<64x16xf32>, vector<16x128xf32>, vector<64x128xf32> -> vector<64x128xf32>
    %c0_3 = arith.constant 0 : index
    %c0_4 = arith.constant 0 : index
    %3 = vector.load %arg2[%c0_3, %c0_4] : memref<1x128xf32, #tpu.memory_space<vmem>>, vector<1x128xf32>
    %4 = vector.broadcast %3 : vector<1x128xf32> to vector<64x128xf32>
    %5 = arith.addf %2, %4 : vector<64x128xf32>
    %cst_5 = arith.constant 0.000000e+00 : f32
    %6 = vector.broadcast %cst_5 : f32 to vector<64x128xf32>
    %7 = arith.maximumf %5, %6 : vector<64x128xf32>
    %c0_6 = arith.constant 0 : index
    %c0_7 = arith.constant 0 : index
    %8 = vector.load %arg3[%c0_6, %c0_7] : memref<128x128xf32, #tpu.memory_space<vmem>>, vector<128x128xf32>
    %cst_8 = arith.constant dense<0.000000e+00> : vector<64x128xf32>
    %9 = tpu.matmul %7, %8, %cst_8 {dimension_numbers = #tpu.dot_dimension_numbers<[1], [0], [0], [1], [0, 0, 1, 1], [], []>} : vector<64x128xf32>, vector<128x128xf32>, vector<64x128xf32> -> vector<64x128xf32>
    %c0_9 = arith.constant 0 : index
    %c0_10 = arith.constant 0 : index
    %10 = vector.load %arg4[%c0_9, %c0_10] : memref<1x128xf32, #tpu.memory_space<vmem>>, vector<1x128xf32>
    %11 = vector.broadcast %10 : vector<1x128xf32> to vector<64x128xf32>
    %12 = arith.addf %9, %11 : vector<64x128xf32>
    %cst_11 = arith.constant 0.000000e+00 : f32
    %13 = vector.broadcast %cst_11 : f32 to vector<64x128xf32>
    %14 = arith.maximumf %12, %13 : vector<64x128xf32>
    %c0_12 = arith.constant 0 : index
    %c0_13 = arith.constant 0 : index
    %15 = vector.load %arg5[%c0_12, %c0_13] : memref<128x128xf32, #tpu.memory_space<vmem>>, vector<128x128xf32>
    %cst_14 = arith.constant dense<0.000000e+00> : vector<64x128xf32>
    %16 = tpu.matmul %14, %15, %cst_14 {dimension_numbers = #tpu.dot_dimension_numbers<[1], [0], [0], [1], [0, 0, 1, 1], [], []>} : vector<64x128xf32>, vector<128x128xf32>, vector<64x128xf32> -> vector<64x128xf32>
    %c0_15 = arith.constant 0 : index
    %c0_16 = arith.constant 0 : index
    %17 = vector.load %arg6[%c0_15, %c0_16] : memref<1x128xf32, #tpu.memory_space<vmem>>, vector<1x128xf32>
    %18 = vector.broadcast %17 : vector<1x128xf32> to vector<64x128xf32>
    %19 = arith.addf %16, %18 : vector<64x128xf32>
    %c0_17 = arith.constant 0 : index
    %c0_18 = arith.constant 0 : index
    %20 = vector.load %arg7[%c0_17, %c0_18] : memref<64x128xf32, #tpu.memory_space<vmem>>, vector<64x128xf32>
    tpu.vector_store %arg7[%c0_17, %c0_18], %19 {strides = array<i32>} : memref<64x128xf32, #tpu.memory_space<vmem>>, vector<64x128xf32>,
    return
  }
}

</mosaic_0001>

<bundles_post_ra>
// kernel: neural_network_forward.1
= control target key start
LH: loop header
LB: loop body
LE: loop exit
PB: predicated region body
PF: predicated region fallthrough
CT: control target
= control target key end

     0   :  { %12 = vsyncpa [#allocation3], 0  ;;  %s829_s0 = inlined_call_operand.vmem [shape: f32[64,16], index: 0, kind: input, shape index: {}]   ;;  %s830_s1 = inlined_call_operand.vmem [shape: f32[16,128], index: 1, kind: input, shape index: {}]   ;;  %s831_s2 = inlined_call_operand.vmem [shape: f32[1,128], index: 2, kind: input, shape index: {}]   ;;  %s832_s3 = inlined_call_operand.hbm [shape: f32[128,128], index: 3, kind: input, shape index: {}]   ;;  %s833_s4 = inlined_call_operand.vmem [shape: f32[1,128], index: 4, kind: input, shape index: {}]   ;;  %s834_s5 = inlined_call_operand.hbm [shape: f32[128,128], index: 5, kind: input, shape index: {}]   ;;  %s835_s6 = inlined_call_operand.vmem [shape: f32[1,128], index: 6, kind: input, shape index: {}]   ;;  %s836_s7 = inlined_call_operand.vmem [shape: f32[64,128], index: 7, kind: output, shape index: {}]  }
   0x1   :  { %13 = vsyncpa [#allocation5], 0  ;;  %s708_s24 = smov [#allocation2]  }
   0x2   :  { %s25_s25 = sshll.u32 %s708_s24, 4  ;;  %s26_s25 = int_to_ptr.vmem [resolvable:$true] %s25_s25 }
   0x3   :  { %s672_s26 = scalar_lea.vmem %s26_s25, 2048  ;;  %p677_p1 = scmp.lt.s32.totalorder %s26_s25, %s26_s25 }
   0x4   :  { %p673_p0 = scmp.ne.s32.totalorder %s26_s25, %s672_s26  ;;  %p678_p2 = scmp.lt.s32.totalorder %s672_s26, %s672_s26 }
   0x6   :  { %p679_p3 = por %p678_p2, %p677_p1 }
   0x8   :  { %p680_p4 = pnand %p679_p3, %p673_p0 }
   0xa   :  { %683 = shalt.err (!%p680_p4)
}
   0xb   :  { %s709_s27 = smov 128   ;;  %s710_s28 = smov 8  }
   0xc   :  { %31 = dma.hbm_to_vmem [thread:$0]  %s832_s3, 2048, %s26_s25, [#allocation3], %s709_s27, %s709_s27, %s710_s28  }
   0xd   :  { %s711_s8 = smov [#allocation4]  }
   0xe   :  { %s39_s9 = sshll.u32 %s711_s8, 4  ;;  %s40_s9 = int_to_ptr.vmem [resolvable:$true] %s39_s9 }
   0xf   :  { %s692_s10 = scalar_lea.vmem %s40_s9, 2048  ;;  %p697_p6 = scmp.lt.s32.totalorder %s40_s9, %s40_s9 }
  0x10   :  { %p693_p5 = scmp.ne.s32.totalorder %s40_s9, %s692_s10  ;;  %p698_p7 = scmp.lt.s32.totalorder %s692_s10, %s692_s10 }
  0x12   :  { %p699_p8 = por %p698_p7, %p697_p6 }
  0x14   :  { %p700_p9 = pnand %p699_p8, %p693_p5 }
  0x16   :  { %703 = shalt.err (!%p700_p9)
}
  0x17   :  { %45 = dma.hbm_to_vmem [thread:$0]  %s834_s5, 2048, %s40_s9, [#allocation5], %s709_s27, %s709_s27, %s710_s28  }
  0x18   :  { %704 = dma.done.wait [#allocation3], 2048  }
  0x19   :  { %705 = vsyncadd [#allocation3], 4294965248 }
  0x1a   :  { %706 = dma.done.wait [#allocation5], 2048  }
  0x1b   :  { %707 = vsyncadd [#allocation5], 4294965248  ;;  %vm71_vm0 = vcmask 130048   ;;  %v63_v0 = vld [vmem:[%s830_s1 + $0x8] sm:$0xff]  ;;  %v62_v1 = vld [vmem:[%s830_s1] sm:$0xff] }
  0x1c   :  { %v54_v2 = vld [vmem:[%s829_s0] sm:$0xff]  ;;  %556 = vmatprep.subr.mxu0 %v63_v0  ;;  %v55_v3 = vld [vmem:[%s829_s0 + $0x8] sm:$0xff]  ;;  %v56_v4 = vld [vmem:[%s829_s0 + $0x10] sm:$0xff] }
  0x1d   :  { %560 = vmatprep.mubr.msk.f32.mxu0 %vm71_vm0, %v54_v2  ;;  %557 = vmatpush3.msra.mxu0 %v63_v0  ;;  %v224_v5 = vld [vmem:[#allocation2 + $0x78] sm:$0xff]  ;;  %v223_v6 = vld [vmem:[#allocation2 + $0x70] sm:$0xff]  ;;  %v222_v7 = vld [vmem:[#allocation2 + $0x68] sm:$0xff] }
  0x1e   :  { %558 = vmatprep.subr.mxu0 %v62_v1  ;;  %572 = vmatprep.subr.mxu1 %v224_v5  ;;  %v57_v8 = vld [vmem:[%s829_s0 + $0x18] sm:$0xff]  ;;  %v58_v9 = vld [vmem:[%s829_s0 + $0x20] sm:$0xff]  ;;  %v59_v12 = vld [vmem:[%s829_s0 + $0x28] sm:$0xff] }
  0x1f   :  { %559 = vmatpush3.msra.mxu0 %v62_v1  ;;  %573 = vmatpush3.msra.mxu1 %v224_v5  ;;  %v221_v10 = vld [vmem:[#allocation2 + $0x60] sm:$0xff]  ;;  %v220_v11 = vld [vmem:[#allocation2 + $0x58] sm:$0xff]  ;;  %v60_v13 = vld [vmem:[%s829_s0 + $0x30] sm:$0xff] }
  0x20   :  { %561 = vmatmul.mubr.msk.f32.vlgmr.msra.gmra.mxu0 %vm71_vm0, %v55_v3  ;;  %574 = vmatprep.subr.mxu1 %v223_v6  ;;  %v219_v14 = vld [vmem:[#allocation2 + $0x50] sm:$0xff]  ;;  %v218_v15 = vld [vmem:[#allocation2 + $0x48] sm:$0xff]  ;;  %v61_v16 = vld [vmem:[%s829_s0 + $0x38] sm:$0xff] }
  0x21   :  { %563 = vmatprep.mubr.msk.f32.mxu0 %vm71_vm0, %v56_v4  ;;  %575 = vmatpush3.msra.mxu1 %v223_v6  ;;  %v217_v17 = vld [vmem:[#allocation2 + $0x40] sm:$0xff]  ;;  %v216_v18 = vld [vmem:[#allocation2 + $0x38] sm:$0xff]  ;;  %v215_v19 = vld [vmem:[#allocation2 + $0x30] sm:$0xff] }
  0x22   :  { %576 = vmatprep.subr.mxu1 %v222_v7  ;;  %v214_v20 = vld [vmem:[#allocation2 + $0x28] sm:$0xff]  ;;  %v213_v21 = vld [vmem:[#allocation2 + $0x20] sm:$0xff]  ;;  %v212_v22 = vld [vmem:[#allocation2 + $0x18] sm:$0xff] }
  0x23   :  { %577 = vmatpush3.msra.mxu1 %v222_v7  ;;  %v211_v23 = vld [vmem:[#allocation2 + $0x10] sm:$0xff]  ;;  %v210_v24 = vld [vmem:[#allocation2 + $0x8] sm:$0xff]  ;;  %v209_v25 = vld [vmem:[#allocation2] sm:$0xff] }
  0x24   :  { %564 = vmatmul.mubr.msk.f32.gmra.mxu0 %vm71_vm0, %v57_v8  ;;  %578 = vmatprep.subr.mxu1 %v221_v10  ;;  %v360_v26 = vld [vmem:[#allocation4 + $0x78] sm:$0xff]  ;;  %v359_v27 = vld [vmem:[#allocation4 + $0x70] sm:$0xff]  ;;  %v358_v28 = vld [vmem:[#allocation4 + $0x68] sm:$0xff] }
  0x25   :  { %566 = vmatprep.mubr.msk.f32.mxu0 %vm71_vm0, %v58_v9  ;;  %579 = vmatpush3.msra.mxu1 %v221_v10  ;;  %v357_v29 = vld [vmem:[#allocation4 + $0x60] sm:$0xff]  ;;  %v356_v30 = vld [vmem:[#allocation4 + $0x58] sm:$0xff]  ;;  %v355_v31 = vld [vmem:[#allocation4 + $0x50] sm:$0xff] }
  0x26   :  { %580 = vmatprep.subr.mxu1 %v220_v11  ;;  %616 = vmatprep.subr.mxu0 %v360_v26  ;;  %v354_v32 = vld [vmem:[#allocation4 + $0x48] sm:$0xff]  ;;  %v353_v33 = vld [vmem:[#allocation4 + $0x40] sm:$0xff]  ;;  %v352_v34 = vld [vmem:[#allocation4 + $0x38] sm:$0xff] }
  0x27   :  { %581 = vmatpush3.msra.mxu1 %v220_v11  ;;  %617 = vmatpush3.msra.mxu0 %v360_v26  ;;  %v351_v35 = vld [vmem:[#allocation4 + $0x30] sm:$0xff]  ;;  %v350_v36 = vld [vmem:[#allocation4 + $0x28] sm:$0xff]  ;;  %v349_v37 = vld [vmem:[#allocation4 + $0x20] sm:$0xff] }
  0x28   :  { %567 = vmatmul.mubr.msk.f32.gmra.mxu0 %vm71_vm0, %v59_v12  ;;  %582 = vmatprep.subr.mxu1 %v219_v14  ;;  %v487_v38 = vld [vmem:[%s831_s2] ss:$0 sm:$0xff]  ;;  %v348_v63 = vld [vmem:[#allocation4 + $0x18] sm:$0xff]  ;;  %v347_v0 = vld [vmem:[#allocation4 + $0x10] sm:$0xff] }
  0x29   :  { %569 = vmatprep.mubr.msk.f32.mxu0 %vm71_vm0, %v60_v13  ;;  %583 = vmatpush3.msra.mxu1 %v219_v14  ;;  %v346_v1 = vld [vmem:[#allocation4 + $0x8] sm:$0xff]  ;;  %v345_v2 = vld [vmem:[#allocation4] sm:$0xff] }
  0x2a   :  { %584 = vmatprep.subr.mxu1 %v218_v15  ;;  %618 = vmatprep.subr.mxu0 %v359_v27  ;;  %v496_v3 = vld [vmem:[%s833_s4] ss:$0 sm:$0xff] }
  0x2b   :  { %585 = vmatpush3.msra.mxu1 %v218_v15  ;;  %619 = vmatpush3.msra.mxu0 %v359_v27 }
  0x2c   :  { %570 = vmatmul.mubr.msk.f32.gmra.mxu0 %vm71_vm0, %v61_v16  ;;  %586 = vmatprep.subr.mxu1 %v217_v17 }
  0x2d   :  { %587 = vmatpush3.msra.mxu1 %v217_v17  ;;  %620 = vmatprep.subr.mxu0 %v358_v28 }
  0x2e   :  { %588 = vmatprep.subr.mxu1 %v216_v18  ;;  %621 = vmatpush3.msra.mxu0 %v358_v28  ;;  %v497_v28 = vld [vmem:[%s835_s6] ss:$0 sm:$0xff] }
  0x2f   :  { %589 = vmatpush3.msra.mxu1 %v216_v18  ;;  %622 = vmatprep.subr.mxu0 %v357_v29 }
  0x30   :  { %590 = vmatprep.subr.mxu1 %v215_v19  ;;  %623 = vmatpush3.msra.mxu0 %v357_v29 }
  0x31   :  { %591 = vmatpush3.msra.mxu1 %v215_v19  ;;  %624 = vmatprep.subr.mxu0 %v356_v30 }
  0x32   :  { %592 = vmatprep.subr.mxu1 %v214_v20  ;;  %625 = vmatpush3.msra.mxu0 %v356_v30 }
  0x33   :  { %593 = vmatpush3.msra.mxu1 %v214_v20  ;;  %626 = vmatprep.subr.mxu0 %v355_v31 }
  0x34   :  { %594 = vmatprep.subr.mxu1 %v213_v21  ;;  %627 = vmatpush3.msra.mxu0 %v355_v31 }
  0x35   :  { %595 = vmatpush3.msra.mxu1 %v213_v21  ;;  %628 = vmatprep.subr.mxu0 %v354_v32 }
  0x36   :  { %596 = vmatprep.subr.mxu1 %v212_v22  ;;  %629 = vmatpush3.msra.mxu0 %v354_v32 }
  0x37   :  { %597 = vmatpush3.msra.mxu1 %v212_v22  ;;  %630 = vmatprep.subr.mxu0 %v353_v33 }
  0x38   :  { %598 = vmatprep.subr.mxu1 %v211_v23  ;;  %631 = vmatpush3.msra.mxu0 %v353_v33 }
  0x39   :  { %599 = vmatpush3.msra.mxu1 %v211_v23  ;;  %632 = vmatprep.subr.mxu0 %v352_v34 }
  0x3a   :  { %600 = vmatprep.subr.mxu1 %v210_v24  ;;  %633 = vmatpush3.msra.mxu0 %v352_v34 }
  0x3b   :  { %601 = vmatpush3.msra.mxu1 %v210_v24  ;;  %634 = vmatprep.subr.mxu0 %v351_v35 }
  0x3c   :  { %602 = vmatprep.subr.mxu1 %v209_v25  ;;  %635 = vmatpush3.msra.mxu0 %v351_v35 }
  0x3d   :  { %603 = vmatpush3.msra.mxu1 %v209_v25  ;;  %636 = vmatprep.subr.mxu0 %v350_v36 }
  0x3e   :  { %637 = vmatpush3.msra.mxu0 %v350_v36 }
  0x3f   :  { %638 = vmatprep.subr.mxu0 %v349_v37 }
  0x40   :  { %639 = vmatpush3.msra.mxu0 %v349_v37 }
  0x41   :  { %640 = vmatprep.subr.mxu0 %v348_v63 }
  0x42   :  { %641 = vmatpush3.msra.mxu0 %v348_v63 }
  0x43   :  { %642 = vmatprep.subr.mxu0 %v347_v0 }
  0x44   :  { %643 = vmatpush3.msra.mxu0 %v347_v0 }
  0x45   :  { %644 = vmatprep.subr.mxu0 %v346_v1 }
  0x46   :  { %645 = vmatpush3.msra.mxu0 %v346_v1 }
  0x47   :  { %646 = vmatprep.subr.mxu0 %v345_v2 }
  0x48   :  { %647 = vmatpush3.msra.mxu0 %v345_v2 }
  0xe0   :  { %v562_v39 = vpop.f32.mrf.mxu0 }
  0xe1   :  { %v168_v40 = vadd.f32 %v562_v39, %v487_v38 }
  0xe2   :  { %v162_v41 = vpop.f32.mrf.mxu0 }
  0xe3   :  { %v163_v42 = vadd.f32 %v487_v38, %v162_v41  ;;  %v202_v45 = vmax.f32 %v168_v40, 0.0 }
  0xe4   :  { %v565_v43 = vpop.f32.mrf.mxu0 }
  0xe5   :  { %v201_v44 = vmax.f32 %v163_v42, 0.0  ;;  %v178_v46 = vadd.f32 %v565_v43, %v487_v38 }
  0xe6   :  { %v172_v47 = vpop.f32.mrf.mxu0 }
  0xe7   :  { %v173_v48 = vadd.f32 %v487_v38, %v172_v47  ;;  %604 = vmatprep.mubr.f32.mxu1 %v201_v44  ;;  %v204_v51 = vmax.f32 %v178_v46, 0.0 }
  0xe8   :  { %v568_v49 = vpop.f32.mrf.mxu0  ;;  %605 = vmatmul.mubr.f32.vlgmr.msra.gmra.mxu1 %v202_v45 }
  0xe9   :  { %v203_v50 = vmax.f32 %v173_v48, 0.0  ;;  %v188_v52 = vadd.f32 %v568_v49, %v487_v38 }
  0xea   :  { %v182_v53 = vpop.f32.mrf.mxu0 }
  0xeb   :  { %v183_v54 = vadd.f32 %v487_v38, %v182_v53  ;;  %607 = vmatprep.mubr.f32.mxu1 %v203_v50  ;;  %v206_v57 = vmax.f32 %v188_v52, 0.0 }
  0xec   :  { %v571_v55 = vpop.f32.mrf.mxu0  ;;  %608 = vmatmul.mubr.f32.gmra.mxu1 %v204_v51 }
  0xed   :  { %v205_v56 = vmax.f32 %v183_v54, 0.0  ;;  %v198_v58 = vadd.f32 %v571_v55, %v487_v38 }
  0xee   :  { %v192_v59 = vpop.f32.mrf.mxu0 }
  0xef   :  { %v193_v60 = vadd.f32 %v487_v38, %v192_v59  ;;  %610 = vmatprep.mubr.f32.mxu1 %v205_v56  ;;  %v208_v62 = vmax.f32 %v198_v58, 0.0 }
  0xf0   :  { %611 = vmatmul.mubr.f32.gmra.mxu1 %v206_v57 }
  0xf1   :  { %v207_v61 = vmax.f32 %v193_v60, 0.0 }
  0xf3   :  { %613 = vmatprep.mubr.f32.mxu1 %v207_v61 }
  0xf4   :  { %614 = vmatmul.mubr.f32.gmra.mxu1 %v208_v62 }
 0x1a8   :  { %v606_v4 = vpop.f32.mrf.mxu1 }
 0x1a9   :  { %v304_v5 = vadd.f32 %v606_v4, %v496_v3 }
 0x1aa   :  { %v298_v6 = vpop.f32.mrf.mxu1 }
 0x1ab   :  { %v299_v7 = vadd.f32 %v496_v3, %v298_v6  ;;  %v338_v10 = vmax.f32 %v304_v5, 0.0 }
 0x1ac   :  { %v609_v8 = vpop.f32.mrf.mxu1 }
 0x1ad   :  { %v337_v9 = vmax.f32 %v299_v7, 0.0  ;;  %v314_v11 = vadd.f32 %v609_v8, %v496_v3 }
 0x1ae   :  { %v308_v12 = vpop.f32.mrf.mxu1 }
 0x1af   :  { %v309_v13 = vadd.f32 %v496_v3, %v308_v12  ;;  %648 = vmatprep.mubr.f32.mxu0 %v337_v9  ;;  %v340_v16 = vmax.f32 %v314_v11, 0.0 }
 0x1b0   :  { %v612_v14 = vpop.f32.mrf.mxu1  ;;  %649 = vmatmul.mubr.f32.vlgmr.msra.gmra.mxu0 %v338_v10 }
 0x1b1   :  { %v339_v15 = vmax.f32 %v309_v13, 0.0  ;;  %v324_v17 = vadd.f32 %v612_v14, %v496_v3 }
 0x1b2   :  { %v318_v18 = vpop.f32.mrf.mxu1 }
 0x1b3   :  { %v319_v19 = vadd.f32 %v496_v3, %v318_v18  ;;  %651 = vmatprep.mubr.f32.mxu0 %v339_v15  ;;  %v342_v22 = vmax.f32 %v324_v17, 0.0 }
 0x1b4   :  { %v615_v20 = vpop.f32.mrf.mxu1  ;;  %652 = vmatmul.mubr.f32.gmra.mxu0 %v340_v16 }
 0x1b5   :  { %v341_v21 = vmax.f32 %v319_v19, 0.0  ;;  %v334_v23 = vadd.f32 %v615_v20, %v496_v3 }
 0x1b6   :  { %v328_v24 = vpop.f32.mrf.mxu1 }
 0x1b7   :  { %v329_v25 = vadd.f32 %v496_v3, %v328_v24  ;;  %654 = vmatprep.mubr.f32.mxu0 %v341_v21  ;;  %v344_v27 = vmax.f32 %v334_v23, 0.0 }
 0x1b8   :  { %655 = vmatmul.mubr.f32.gmra.mxu0 %v342_v22 }
 0x1b9   :  { %v343_v26 = vmax.f32 %v329_v25, 0.0 }
 0x1bb   :  { %657 = vmatprep.mubr.f32.mxu0 %v343_v26 }
 0x1bc   :  { %658 = vmatmul.mubr.f32.gmra.mxu0 %v344_v27 }
 0x270   :  { %v650_v29 = vpop.f32.mrf.mxu0 }
 0x271   :  { %v440_v30 = vadd.f32 %v650_v29, %v497_v28 }
 0x272   :  { %v434_v31 = vpop.f32.mrf.mxu0 }
 0x273   :  { %474 = vst [vmem:[%s836_s7 + $0x8] sm:$0xff] %v440_v30  ;;  %v435_v32 = vadd.f32 %v497_v28, %v434_v31 }
 0x274   :  { %v653_v33 = vpop.f32.mrf.mxu0 }
 0x275   :  { %473 = vst [vmem:[%s836_s7] sm:$0xff] %v435_v32  ;;  %v450_v34 = vadd.f32 %v653_v33, %v497_v28 }
 0x276   :  { %v444_v35 = vpop.f32.mrf.mxu0 }
 0x277   :  { %476 = vst [vmem:[%s836_s7 + $0x18] sm:$0xff] %v450_v34  ;;  %v445_v36 = vadd.f32 %v497_v28, %v444_v35 }
 0x278   :  { %v656_v37 = vpop.f32.mrf.mxu0 }
 0x279   :  { %475 = vst [vmem:[%s836_s7 + $0x10] sm:$0xff] %v445_v36  ;;  %v460_v38 = vadd.f32 %v656_v37, %v497_v28 }
 0x27a   :  { %v454_v39 = vpop.f32.mrf.mxu0 }
 0x27b   :  { %478 = vst [vmem:[%s836_s7 + $0x28] sm:$0xff] %v460_v38  ;;  %v455_v40 = vadd.f32 %v497_v28, %v454_v39 }
 0x27c   :  { %v659_v41 = vpop.f32.mrf.mxu0 }
 0x27d   :  { %477 = vst [vmem:[%s836_s7 + $0x20] sm:$0xff] %v455_v40  ;;  %v470_v42 = vadd.f32 %v659_v41, %v497_v28 }
 0x27e   :  { %v464_v43 = vpop.f32.mrf.mxu0 }
 0x27f   :  { %480 = vst [vmem:[%s836_s7 + $0x38] sm:$0xff] %v470_v42  ;;  %v465_v44 = vadd.f32 %v497_v28, %v464_v43 }
 0x281   :  { %479 = vst [vmem:[%s836_s7 + $0x30] sm:$0xff] %v465_v44 }
 0x282   :  { %485 = vsyncpa [#allocation3], 1 }
 0x283   :  { %486 = vsyncpa [#allocation5], 1 }

</bundles_post_ra>
